<compile_context>
chip_gen: v6e
topology: v6e:2x2x1
jax: 0.10.0
libtpu: 0.0.40
codegen_flags: <defaults>
</compile_context>

<pallas_src>
import functools
import math

import jax
import jax.numpy as jnp
from jax import lax
from jax.experimental import pallas as pl
from jax.experimental.pallas import tpu as pltpu


# ----------------------------------------------------------------------------
# Generation-aware VMEM budgeting (v5e/v6e: 128 MiB physical, v7x: 64 MiB).
# ----------------------------------------------------------------------------
@functools.lru_cache(maxsize=None)
def _vmem_limit_bytes():
    cap = 64 * 1024 * 1024
    try:
        cap = int(pltpu.get_tpu_info().vmem_capacity_bytes)
    except Exception:
        pass
    return max(32 * 1024 * 1024, (int(cap) * 3) // 4)


@functools.lru_cache(maxsize=None)
def _tile_caps():
    """(tm_max, tn_max, tk_max) — bigger tiles amortize the ~0.35us/step
    overhead on 128 MiB chips; v7x (64 MiB) keeps the smaller caps."""
    if _vmem_limit_bytes() >= 72 * 1024 * 1024:
        return 512, 1024, 512          # v5e / v6e
    return 256, 512, 512               # v7x


def _pick_tile(dim, max_tile, granule):
    """Return (tile, padded_dim).

    Prefers the largest aligned divisor of `dim` <= max_tile.  If the dim is
    small, the full dim is a legal block.  If no aligned divisor exists
    (e.g. vocab 30522) the dim is zero-padded up to a multiple of the maximal
    aligned tile instead of falling back to one giant full-dim tile.
    """
    if dim <= max_tile:
        return dim, dim
    t = (max_tile // granule) * granule
    while t >= granule:
        if dim % t == 0:
            return t, dim
        t -= granule
    t = (max_tile // granule) * granule
    padded = ((dim + t - 1) // t) * t
    return t, padded


def _pad_axis(a, axis, target):
    if a.shape[axis] == target:
        return a
    pad = [(0, 0)] * a.ndim
    pad[axis] = (0, target - a.shape[axis])
    return jnp.pad(a, pad)


# ----------------------------------------------------------------------------
# Tiled dense (K-accumulated) with optional activation epilogue
# ----------------------------------------------------------------------------
def _dense_kernel(x_ref, w_ref, b_ref, o_ref, acc_ref, *, activation):
    k = pl.program_id(2)

    @pl.when(k == 0)
    def _():
        acc_ref[...] = jnp.zeros_like(acc_ref)

    acc_ref[...] += jnp.dot(
        x_ref[...].astype(jnp.bfloat16),
        w_ref[...].astype(jnp.bfloat16),
        preferred_element_type=jnp.float32,
    )

    @pl.when(k == pl.num_programs(2) - 1)
    def _():
        y = acc_ref[...] + b_ref[...]            # f32 epilogue (VPU)
        if activation == "relu":
            y = jnp.maximum(y, 0.0)
        elif activation == "tanh":
            y = jnp.tanh(y)
        o_ref[...] = y.astype(o_ref.dtype)


def dense(x, w, b, activation="none", out_dtype=jnp.bfloat16):
    """y = act(x @ w + b).  x: (..., K) bf16/f32, w: (K, N) bf16, b: (1, N) f32."""
    tm_max, tn_max, tk_max = _tile_caps()
    orig_shape = x.shape
    x2 = x.reshape(-1, orig_shape[-1])
    M, K = x2.shape
    N = w.shape[1]
    tm, Mp = _pick_tile(M, tm_max, 8)
    tn, Np = _pick_tile(N, tn_max, 128)
    tk, Kp = _pick_tile(K, tk_max, 128)
    x2 = _pad_axis(_pad_axis(x2, 0, Mp), 1, Kp)
    w_p = _pad_axis(_pad_axis(w, 0, Kp), 1, Np)
    b_p = _pad_axis(b, 1, Np)
    grid = (Mp // tm, Np // tn, Kp // tk)
    out = pl.pallas_call(
        functools.partial(_dense_kernel, activation=activation),
        grid=grid,
        in_specs=[
            pl.BlockSpec((tm, tk), lambda i, j, k: (i, k)),
            pl.BlockSpec((tk, tn), lambda i, j, k: (k, j)),
            pl.BlockSpec((1, tn), lambda i, j, k: (0, j)),
        ],
        out_specs=pl.BlockSpec((tm, tn), lambda i, j, k: (i, j)),
        out_shape=jax.ShapeDtypeStruct((Mp, Np), out_dtype),
        scratch_shapes=[pltpu.VMEM((tm, tn), jnp.float32)],
        compiler_params=pltpu.CompilerParams(
            dimension_semantics=("parallel", "parallel", "arbitrary"),
            vmem_limit_bytes=_vmem_limit_bytes(),
        ),
    )(x2, w_p, b_p)
    if (Mp, Np) != (M, N):
        out = out[:M, :N]
    return out.reshape(orig_shape[:-1] + (N,))


# ----------------------------------------------------------------------------
# Tiled dense fused with optional relu, optional residual-add, and LayerNorm
# (used for ffn2 -> ln2 and the MLM Linear -> ReLU -> LayerNorm fusion).
# LN needs the full feature dim resident, so N is not tiled here.
# ----------------------------------------------------------------------------
def _dense_norm_kernel(*refs, eps, activation, has_residual):
    if has_residual:
        x_ref, w_ref, b_ref, r_ref, g_ref, bt_ref, o_ref, acc_ref = refs
    else:
        x_ref, w_ref, b_ref, g_ref, bt_ref, o_ref, acc_ref = refs
        r_ref = None
    k = pl.program_id(1)

    @pl.when(k == 0)
    def _():
        acc_ref[...] = jnp.zeros_like(acc_ref)

    acc_ref[...] += jnp.dot(
        x_ref[...].astype(jnp.bfloat16),
        w_ref[...].astype(jnp.bfloat16),
        preferred_element_type=jnp.float32,
    )

    @pl.when(k == pl.num_programs(1) - 1)
    def _():
        z = acc_ref[...] + b_ref[...]
        if activation == "relu":
            z = jnp.maximum(z, 0.0)
        if has_residual:
            z = z + r_ref[...].astype(jnp.float32)
        mean = jnp.mean(z, axis=-1, keepdims=True)
        var = jnp.mean((z - mean) ** 2, axis=-1, keepdims=True)
        zn = (z - mean) * lax.rsqrt(var + eps)
        o_ref[...] = (zn * g_ref[...] + bt_ref[...]).astype(o_ref.dtype)


def dense_norm(x, w, b, gamma, beta, residual=None, activation="none",
               eps=1e-5, out_dtype=jnp.bfloat16):
    """LayerNorm( [residual +] act(x @ w + b) ) over the full feature dim."""
    tm_max, _, tk_max = _tile_caps()
    orig_shape = x.shape
    x2 = x.reshape(-1, orig_shape[-1])
    M, K = x2.shape
    N = w.shape[1]
    tm, Mp = _pick_tile(M, tm_max, 8)
    tk, Kp = _pick_tile(K, tk_max, 128)
    x2 = _pad_axis(_pad_axis(x2, 0, Mp), 1, Kp)
    w_p = _pad_axis(w, 0, Kp)
    grid = (Mp // tm, Kp // tk)
    has_residual = residual is not None

    in_specs = [
        pl.BlockSpec((tm, tk), lambda i, k: (i, k)),
        pl.BlockSpec((tk, N), lambda i, k: (k, 0)),
        pl.BlockSpec((1, N), lambda i, k: (0, 0)),
    ]
    operands = [x2, w_p, b]
    if has_residual:
        r2 = _pad_axis(residual.reshape(-1, N), 0, Mp)
        in_specs.append(pl.BlockSpec((tm, N), lambda i, k: (i, 0)))
        operands.append(r2)
    in_specs += [pl.BlockSpec((1, N), lambda i, k: (0, 0)),
                 pl.BlockSpec((1, N), lambda i, k: (0, 0))]
    operands += [gamma, beta]

    out = pl.pallas_call(
        functools.partial(_dense_norm_kernel, eps=eps, activation=activation,
                          has_residual=has_residual),
        grid=grid,
        in_specs=in_specs,
        out_specs=pl.BlockSpec((tm, N), lambda i, k: (i, 0)),
        out_shape=jax.ShapeDtypeStruct((Mp, N), out_dtype),
        scratch_shapes=[pltpu.VMEM((tm, N), jnp.float32)],
        compiler_params=pltpu.CompilerParams(
            dimension_semantics=("parallel", "arbitrary"),
            vmem_limit_bytes=_vmem_limit_bytes(),
        ),
    )(*operands)
    if Mp != M:
        out = out[:M]
    return out.reshape(orig_shape[:-1] + (N,))


# ----------------------------------------------------------------------------
# Fused multi-head masked attention + output projection (Wo) + residual-add +
# LayerNorm.  One grid step per batch element; heads accumulate their Wo-
# projected outputs into a lane-dense (S, D) f32 VMEM scratch, so the only
# store is one full-width (S, D) store (no 64-lane masked partial stores).
# QKV slab is never materialized whole; per-head static ref slices are used.
# ----------------------------------------------------------------------------
def _attn_addnorm_kernel(vl_ref, qkv_ref, wo_ref, wob_ref, r_ref, g_ref,
                         bt_ref, o_ref, acc_ref, *, scale, num_heads,
                         head_dim, model_dim, eps):
    b = pl.program_id(0)
    vl = vl_ref[b]
    S = acc_ref.shape[0]
    col = lax.broadcasted_iota(jnp.int32, (S, S), 1)
    keep = col < vl                              # d2l masked_softmax over keys

    acc_ref[...] = jnp.zeros_like(acc_ref)

    # TODO(synk): for very large num_heads a head grid axis (or head-pair
    # blocking) would bound live ranges further; static unroll is fine here.
    for h in range(num_heads):
        lo = h * head_dim
        # Fold the softmax scale into q before the bf16 cast (cheaper than
        # scaling the (S, S) score matrix).
        q = (qkv_ref[:, lo:lo + head_dim].astype(jnp.float32)
             * scale).astype(jnp.bfloat16)
        k = qkv_ref[:, model_dim + lo:model_dim + lo + head_dim]
        v = qkv_ref[:, 2 * model_dim + lo:2 * model_dim + lo + head_dim]
        # q @ k^T without an explicit transpose: contract dim 1 with dim 1.
        s = lax.dot_general(q, k, (((1,), (1,)), ((), ())),
                            preferred_element_type=jnp.float32)
        s = jnp.where(keep, s, -1e6)             # d2l fill value
        s = s - jnp.max(s, axis=-1, keepdims=True)
        p = jnp.exp(s)
        p = p * pl.reciprocal(jnp.sum(p, axis=-1, keepdims=True), approx=True)
        o_h = jnp.dot(p.astype(jnp.bfloat16), v,
                      preferred_element_type=jnp.float32)       # (S, Dh) f32
        # Fused per-head output projection: accumulate into (S, D) scratch.
        acc_ref[...] += jnp.dot(o_h.astype(jnp.bfloat16),
                                wo_ref[lo:lo + head_dim, :],
                                preferred_element_type=jnp.float32)

    # Residual add + LayerNorm epilogue (ln1), single lane-dense store.
    z = acc_ref[...] + wob_ref[...] + r_ref[...].astype(jnp.float32)
    mean = jnp.mean(z, axis=-1, keepdims=True)
    var = jnp.mean((z - mean) ** 2, axis=-1, keepdims=True)
    zn = (z - mean) * lax.rsqrt(var + eps)
    o_ref[...] = (zn * g_ref[...] + bt_ref[...]).astype(o_ref.dtype)


def attention_addnorm(qkv, residual, wo_w, wo_b, gamma, beta, valid_lens,
                      num_heads, eps=1e-5):
    """qkv: (B, S, 3D) bf16; residual: (B, S, D) bf16 -> LN(X + attn @ Wo + b)."""
    B, S, D3 = qkv.shape
    D = D3 // 3
    Dh = D // num_heads
    scale = 1.0 / math.sqrt(Dh)
    grid_spec = pltpu.PrefetchScalarGridSpec(
        num_scalar_prefetch=1,
        grid=(B,),
        in_specs=[
            pl.BlockSpec((None, S, D3), lambda b, vl: (b, 0, 0)),   # qkv slab
            pl.BlockSpec((D, D), lambda b, vl: (0, 0)),             # Wo
            pl.BlockSpec((1, D), lambda b, vl: (0, 0)),             # Wo bias
            pl.BlockSpec((None, S, D), lambda b, vl: (b, 0, 0)),    # residual
            pl.BlockSpec((1, D), lambda b, vl: (0, 0)),             # gamma
            pl.BlockSpec((1, D), lambda b, vl: (0, 0)),             # beta
        ],
        out_specs=pl.BlockSpec((None, S, D), lambda b, vl: (b, 0, 0)),
        scratch_shapes=[pltpu.VMEM((S, D), jnp.float32)],
    )
    return pl.pallas_call(
        functools.partial(_attn_addnorm_kernel, scale=scale,
                          num_heads=num_heads, head_dim=Dh, model_dim=D,
                          eps=eps),
        grid_spec=grid_spec,
        out_shape=jax.ShapeDtypeStruct((B, S, D), jnp.bfloat16),
        compiler_params=pltpu.CompilerParams(
            dimension_semantics=("parallel",),
            vmem_limit_bytes=_vmem_limit_bytes(),
        ),
    )(valid_lens, qkv, wo_w, wo_b, residual, gamma, beta)


# ----------------------------------------------------------------------------
# Parameter init (deterministic, synthetic).  Matmul weights stored in bf16
# (f32 accumulation inside the kernels); biases / LN params stay f32.
# ----------------------------------------------------------------------------
def _linear_init(key, din, dout, dtype=jnp.bfloat16, scale=0.02):
    kw, _ = jax.random.split(key)
    w = jax.random.normal(kw, (din, dout), jnp.float32) * scale
    return {"w": w.astype(dtype), "b": jnp.zeros((1, dout), jnp.float32)}


def _ln_init(d):
    return {"g": jnp.ones((1, d), jnp.float32), "b": jnp.zeros((1, d), jnp.float32)}


def init_params(key, cfg):
    V, D = cfg["vocab_size"], cfg["num_hiddens"]
    F = cfg["ffn_num_hiddens"]
    keys = jax.random.split(key, 8 + cfg["num_layers"])
    params = {
        "tok_emb": jax.random.normal(keys[0], (V, D), jnp.float32) * 0.02,
        "seg_emb": jax.random.normal(keys[1], (2, D), jnp.float32) * 0.02,
        "pos_emb": jax.random.normal(keys[2], (1, cfg["max_len"], D), jnp.float32) * 0.02,
        "blocks": [],
        # Tiny pooler / NSP heads run in plain XLA -> keep f32 weights.
        "hidden": _linear_init(keys[3], cfg["hid_in_features"], D, dtype=jnp.float32),
        "mlm_l1": _linear_init(keys[4], D, cfg["mlm_in_features"]),
        "mlm_ln": _ln_init(cfg["mlm_in_features"]),
        "mlm_l2": _linear_init(keys[5], cfg["mlm_in_features"], V),
        "nsp": _linear_init(keys[6], cfg["nsp_in_features"], 2, dtype=jnp.float32),
    }
    for i in range(cfg["num_layers"]):
        bkeys = jax.random.split(keys[8 + i], 6)
        # Fused QKV projection: W_q | W_k | W_v concatenated -> (D, 3D).
        wq = _linear_init(bkeys[0], cfg["query_size"], D)
        wk = _linear_init(bkeys[1], cfg["key_size"], D)
        wv = _linear_init(bkeys[2], cfg["value_size"], D)
        params["blocks"].append({
            "wqkv": {
                "w": jnp.concatenate([wq["w"], wk["w"], wv["w"]], axis=1),
                "b": jnp.concatenate([wq["b"], wk["b"], wv["b"]], axis=1),
            },
            "wo": _linear_init(bkeys[3], D, D),
            "ln1": _ln_init(D),
            "ffn1": _linear_init(bkeys[4], cfg["ffn_num_input"], F),
            "ffn2": _linear_init(bkeys[5], F, D),
            "ln2": _ln_init(D),
        })
    return params


# ----------------------------------------------------------------------------
# Model forward (glue in JAX, hot paths in Pallas).  All inter-layer
# activations are bf16; kernels accumulate / normalize in f32.
# ----------------------------------------------------------------------------
def encoder_block_forward(p, cfg, X, valid_lens):
    H = cfg["num_heads"]

    # Fused Q/K/V projection: X read from HBM once, lane-dense 3D bf16 output.
    qkv = dense(X, p["wqkv"]["w"], p["wqkv"]["b"])                 # (B, S, 3D)
    # Attention + Wo projection + residual + LayerNorm (ln1), fully fused.
    # TODO(synk): dropout inside AddNorm / attention omitted (eval mode).
    Y = attention_addnorm(qkv, X, p["wo"]["w"], p["wo"]["b"],
                          p["ln1"]["g"], p["ln1"]["b"], valid_lens, H)

    ffn = dense(Y, p["ffn1"]["w"], p["ffn1"]["b"], activation="relu")
    # ffn2 projection fused with residual-add + LayerNorm (ln2).
    return dense_norm(ffn, p["ffn2"]["w"], p["ffn2"]["b"],
                      p["ln2"]["g"], p["ln2"]["b"], residual=Y)


def bert_forward(params, cfg, tokens, segments, valid_lens, pred_positions):
    B, S = tokens.shape
    V = cfg["vocab_size"]

    # Encoder (embedding lookups stay in JAX: index glue); bf16 activations.
    X = params["tok_emb"][tokens] + params["seg_emb"][segments]
    X = (X + params["pos_emb"][:, :S, :]).astype(jnp.bfloat16)
    for blk in params["blocks"]:
        X = encoder_block_forward(blk, cfg, X, valid_lens)
    encoded_X = X                                                   # bf16

    # MaskLM head (gather stays in JAX).  Linear -> ReLU -> LayerNorm fused
    # into one Pallas call; the vocab projection outputs f32 logits.
    num_pred = pred_positions.shape[1]
    batch_idx = jnp.repeat(jnp.arange(B), num_pred)
    masked_X = encoded_X[batch_idx, pred_positions.reshape(-1)]    # (B*P, D)
    h = dense_norm(masked_X, params["mlm_l1"]["w"], params["mlm_l1"]["b"],
                   params["mlm_ln"]["g"], params["mlm_ln"]["b"],
                   activation="relu")
    mlm_Y_hat = dense(h, params["mlm_l2"]["w"], params["mlm_l2"]["b"],
                      out_dtype=jnp.float32)
    mlm_Y_hat = mlm_Y_hat.reshape(B, num_pred, V)

    # NSP head: tiny matmuls -> plain XLA (a pallas_call here is pure launch
    # overhead).
    cls = encoded_X[:, 0, :].astype(jnp.float32)
    hidden = jnp.tanh(cls @ params["hidden"]["w"] + params["hidden"]["b"])
    nsp_Y_hat = hidden @ params["nsp"]["w"] + params["nsp"]["b"]

    return encoded_X.astype(jnp.float32), mlm_Y_hat, nsp_Y_hat


# ----------------------------------------------------------------------------
if __name__ == "__main__":
    cfg = dict(
        vocab_size=128, num_hiddens=32, norm_shape=(32,),
        ffn_num_input=32, ffn_num_hiddens=64, num_heads=2, num_layers=2,
        dropout=0.0, max_len=16, key_size=32, query_size=32, value_size=32,
        hid_in_features=32, mlm_in_features=32, nsp_in_features=32,
    )
    B, S, P = 2, 8, 3

    key = jax.random.PRNGKey(0)
    kp, kt, ks, kpp = jax.random.split(key, 4)
    params = init_params(kp, cfg)

    tokens = jax.random.randint(kt, (B, S), 0, cfg["vocab_size"], dtype=jnp.int32)
    segments = jax.random.randint(ks, (B, S), 0, 2, dtype=jnp.int32)
    valid_lens = jnp.array([6, 8], dtype=jnp.int32)
    pred_positions = jax.random.randint(kpp, (B, P), 0, S, dtype=jnp.int32)

    encoded_X, mlm_Y_hat, nsp_Y_hat = bert_forward(
        params, cfg, tokens, segments, valid_lens, pred_positions)

    jax.block_until_ready((encoded_X, mlm_Y_hat, nsp_Y_hat))
    assert encoded_X.shape == (B, S, cfg["num_hiddens"])
    assert mlm_Y_hat.shape == (B, P, cfg["vocab_size"])
    assert nsp_Y_hat.shape == (B, 2)
    print("KERNEL_OK")
</pallas_src>

<mosaic_0001>
module attributes {stable_mosaic.version = 11 : i64} {
  func.func @_dense_kernel(%arg0: i32, %arg1: i32, %arg2: i32, %arg3: memref<16x32xbf16, #tpu.memory_space<vmem>>, %arg4: memref<32x96xbf16, #tpu.memory_space<vmem>>, %arg5: memref<1x96xf32, #tpu.memory_space<vmem>>, %arg6: memref<16x96xbf16, #tpu.memory_space<vmem>>, %arg7: memref<16x96xf32, #tpu.memory_space<vmem>>) attributes {dimension_semantics = [#tpu.dimension_semantics<parallel>, #tpu.dimension_semantics<parallel>, #tpu.dimension_semantics<arbitrary>], iteration_bounds = array<i64: 1, 1, 1>, scalar_prefetch = 0 : i64, scratch_operands = 1 : i64, tpu.core_type = #tpu.core_type<tc>, window_params = [{transform_indices = @transform_0, window_bounds = array<i64: 16, 32>}, {transform_indices = @transform_1, window_bounds = array<i64: 32, 96>}, {transform_indices = @transform_2, window_bounds = array<i64: 1, 96>}, {transform_indices = @transform_3, window_bounds = array<i64: 16, 96>}]} {
    %c0_i32 = arith.constant 0 : i32
    %0 = arith.cmpi eq, %arg2, %c0_i32 : i32
    %1 = arith.extui %0 : i1 to i32
    %c0_i32_0 = arith.constant 0 : i32
    %2 = arith.cmpi ne, %1, %c0_i32_0 : i32
    scf.if %2 {
      %cst_10 = arith.constant 0.000000e+00 : f32
      %12 = vector.broadcast %cst_10 : f32 to vector<16x96xf32>
      %c0_11 = arith.constant 0 : index
      %c0_12 = arith.constant 0 : index
      %13 = vector.load %arg7[%c0_11, %c0_12] : memref<16x96xf32, #tpu.memory_space<vmem>>, vector<16x96xf32>
      tpu.vector_store %arg7[%c0_11, %c0_12], %12 {strides = array<i32>} : memref<16x96xf32, #tpu.memory_space<vmem>>, vector<16x96xf32>,
    } else {
    }
    %c0 = arith.constant 0 : index
    %c0_1 = arith.constant 0 : index
    %3 = vector.load %arg7[%c0, %c0_1] : memref<16x96xf32, #tpu.memory_space<vmem>>, vector<16x96xf32>
    %c0_2 = arith.constant 0 : index
    %c0_3 = arith.constant 0 : index
    %4 = vector.load %arg3[%c0_2, %c0_3] : memref<16x32xbf16, #tpu.memory_space<vmem>>, vector<16x32xbf16>
    %c0_4 = arith.constant 0 : index
    %c0_5 = arith.constant 0 : index
    %5 = vector.load %arg4[%c0_4, %c0_5] : memref<32x96xbf16, #tpu.memory_space<vmem>>, vector<32x96xbf16>
    %cst = arith.constant dense<0.000000e+00> : vector<16x96xf32>
    %6 = tpu.matmul %4, %5, %cst {dimension_numbers = #tpu.dot_dimension_numbers<[1], [0], [0], [1], [0, 0, 1, 1], [], []>} : vector<16x32xbf16>, vector<32x96xbf16>, vector<16x96xf32> -> vector<16x96xf32>
    %7 = arith.addf %3, %6 : vector<16x96xf32>
    %c0_6 = arith.constant 0 : index
    %c0_7 = arith.constant 0 : index
    %8 = vector.load %arg7[%c0_6, %c0_7] : memref<16x96xf32, #tpu.memory_space<vmem>>, vector<16x96xf32>
    tpu.vector_store %arg7[%c0_6, %c0_7], %7 {strides = array<i32>} : memref<16x96xf32, #tpu.memory_space<vmem>>, vector<16x96xf32>,
    %c0_i32_8 = arith.constant 0 : i32
    %9 = arith.cmpi eq, %arg2, %c0_i32_8 : i32
    %10 = arith.extui %9 : i1 to i32
    %c0_i32_9 = arith.constant 0 : i32
    %11 = arith.cmpi ne, %10, %c0_i32_9 : i32
    scf.if %11 {
      %c0_10 = arith.constant 0 : index
      %c0_11 = arith.constant 0 : index
      %12 = vector.load %arg7[%c0_10, %c0_11] : memref<16x96xf32, #tpu.memory_space<vmem>>, vector<16x96xf32>
      %c0_12 = arith.constant 0 : index
      %c0_13 = arith.constant 0 : index
      %13 = vector.load %arg5[%c0_12, %c0_13] : memref<1x96xf32, #tpu.memory_space<vmem>>, vector<1x96xf32>
      %14 = vector.broadcast %13 : vector<1x96xf32> to vector<16x96xf32>
      %15 = arith.addf %12, %14 : vector<16x96xf32>
      %16 = arith.truncf %15 : vector<16x96xf32> to vector<16x96xbf16>
      %c0_14 = arith.constant 0 : index
      %c0_15 = arith.constant 0 : index
      %17 = vector.load %arg6[%c0_14, %c0_15] : memref<16x96xbf16, #tpu.memory_space<vmem>>, vector<16x96xbf16>
      tpu.vector_store %arg6[%c0_14, %c0_15], %16 {strides = array<i32>} : memref<16x96xbf16, #tpu.memory_space<vmem>>, vector<16x96xbf16>,
    } else {
    }
    return
  }
  func.func @transform_0(%arg0: i32, %arg1: i32, %arg2: i32) -> (i32, i32) {
    %c0_i32 = arith.constant 0 : i32
    return %arg0, %arg2 : i32, i32
  }
  func.func @transform_1(%arg0: i32, %arg1: i32, %arg2: i32) -> (i32, i32) {
    %c0_i32 = arith.constant 0 : i32
    return %arg2, %arg1 : i32, i32
  }
  func.func @transform_2(%arg0: i32, %arg1: i32, %arg2: i32) -> (i32, i32) {
    %c0_i32 = arith.constant 0 : i32
    %c0_i32_0 = arith.constant 0 : i32
    return %c0_i32, %arg1 : i32, i32
  }
  func.func @transform_3(%arg0: i32, %arg1: i32, %arg2: i32) -> (i32, i32) {
    %c0_i32 = arith.constant 0 : i32
    return %arg0, %arg1 : i32, i32
  }
}

</mosaic_0001>

<bundles_post_ra>
// kernel: tpu_custom_call.1
= control target key start
LH: loop header
LB: loop body
LE: loop exit
PB: predicated region body
PF: predicated region fallthrough
CT: control target
= control target key end

     0   :  { %8 = vsyncpa [#allocation4], 0  ;;  %s317_s0 = inlined_call_operand.hbm [shape: bf16[16,32], index: 0, kind: input, shape index: {}]   ;;  %s318_s1 = inlined_call_operand.hbm [shape: bf16[32,96], index: 1, kind: input, shape index: {}]   ;;  %s319_s2 = inlined_call_operand.vmem [shape: f32[1,96], index: 2, kind: input, shape index: {}]   ;;  %s320_s3 = inlined_call_operand.hbm [shape: bf16[16,96], index: 3, kind: output, shape index: {}]  }
   0x1   :  { %9 = vsyncpa [#allocation7], 0 }
   0x2   :  { %10 = vsyncpa [#allocation5], 0  ;;  %s265_s12 = smov [#allocation3]  }
   0x3   :  { %s16_s13 = sshll.u32 %s265_s12, 4  ;;  %s17_s13 = int_to_ptr.vmem [resolvable:$true] %s16_s13 }
   0x4   :  { %s207_s14 = scalar_lea.vmem %s17_s13, 128  ;;  %p212_p1 = scmp.lt.s32.totalorder %s17_s13, %s17_s13 }
   0x5   :  { %p208_p0 = scmp.ne.s32.totalorder %s17_s13, %s207_s14  ;;  %p213_p2 = scmp.lt.s32.totalorder %s207_s14, %s207_s14 }
   0x7   :  { %p214_p3 = por %p213_p2, %p212_p1 }
   0x9   :  { %p215_p4 = pnand %p214_p3, %p208_p0 }
   0xb   :  { %218 = shalt.err (!%p215_p4)
}
   0xc   :  { %s266_s15 = smov 64   ;;  %s267_s16 = smov 4  }
   0xd   :  { %22 = dma.hbm_to_vmem [thread:$0]  %s317_s0, 128, %s17_s13, [#allocation4], %s266_s15, %s266_s15, %s267_s16  }
   0xe   :  { %s268_s19 = smov [#allocation6]  }
   0xf   :  { %s28_s20 = sshll.u32 %s268_s19, 4  ;;  %s29_s20 = int_to_ptr.vmem [resolvable:$true] %s28_s20 }
  0x10   :  { %s227_s21 = scalar_lea.vmem %s29_s20, 256  ;;  %p232_p6 = scmp.lt.s32.totalorder %s29_s20, %s29_s20 }
  0x11   :  { %p228_p5 = scmp.ne.s32.totalorder %s29_s20, %s227_s21  ;;  %p233_p7 = scmp.lt.s32.totalorder %s227_s21, %s227_s21 }
  0x13   :  { %p234_p8 = por %p233_p7, %p232_p6 }
  0x15   :  { %p235_p9 = pnand %p234_p8, %p228_p5 }
  0x17   :  { %238 = shalt.err (!%p235_p9)
}
  0x18   :  { %34 = dma.hbm_to_vmem [thread:$0]  %s318_s1, 256, %s29_s20, [#allocation7], %s266_s15, %s266_s15, %s267_s16  }
  0x19   :  { %259 = dma.done.wait [#allocation4], 128  }
  0x1a   :  { %260 = vsyncadd [#allocation4], 4294967168 }
  0x1b   :  { %261 = dma.done.wait [#allocation7], 256  }
  0x1c   :  { %262 = vsyncadd [#allocation7], 4294967040  ;;  %vm48_vm0 = vcmask 785408   ;;  %v269_v0 = vmov 0.0   ;;  %vm270_vm1 = vmmov 0   ;;  %v196_v1 = vld [vmem:[#allocation6 + $0x8] sm:$0xff]  }
  0x1d   :  { %49 = vst.msk [vmem:[#allocation2] sm:$0xff] %vm48_vm0, %v269_v0  ;;  %50 = vst.msk [vmem:[#allocation2 + $0x8] sm:$0xff] %vm48_vm0, %v269_v0  ;;  %181 = vmatprep.subr.bf16.mxu0 %v269_v0  ;;  %185 = vmatprep.mubr.msk.bf16.mxu0 %vm270_vm1, %v269_v0  ;;  %v197_v2 = vld [vmem:[#allocation6] sm:$0xff]   ;;  %v198_v3 = vld [vmem:[#allocation3] sm:$0xff]   ;;  %vm76_vm2 = vcmask 261120   ;;  %vm148_vm3 = vcmask 781312  }
  0x1e   :  { %182 = vmatpush3.bf16.msra.mxu0 %v196_v1  ;;  %v173_v12 = vld [vmem:[%s319_s2] ss:$0 sm:$0xff]  ;;  %s271_s24 = smov [#allocation8]  }
  0x1f   :  { %183 = vmatprep.subr.bf16.mxu0 %v269_v0  ;;  %s156_s25 = sshll.u32 %s271_s24, 4  ;;  %s157_s25 = int_to_ptr.vmem [resolvable:$true] %s156_s25 }
  0x20   :  { %s239_s26 = scalar_lea.vmem %s157_s25, 128  ;;  %p244_p11 = scmp.lt.s32.totalorder %s157_s25, %s157_s25 }
  0x21   :  { %p240_p10 = scmp.ne.s32.totalorder %s157_s25, %s239_s26  ;;  %p245_p12 = scmp.lt.s32.totalorder %s239_s26, %s239_s26 }
  0x22   :  { %184 = vmatpush3.bf16.msra.mxu0 %v197_v2 }
  0x23   :  { %p246_p13 = por %p245_p12, %p244_p11 }
  0x24   :  { %v51_v4 = vld [vmem:[#allocation2] sm:$0xff]  ;;  %v52_v8 = vld [vmem:[#allocation2 + $0x8] sm:$0xff] }
  0x25   :  { %186 = vmatmul.mubr.msk.bf16.vlgmr.msra.gmra.mxu0 %vm76_vm2, %v198_v3  ;;  %p247_p0 = pnand %p246_p13, %p240_p10 }
  0xe5   :  { %v114_v5 = vpop.f32.mrf.mxu0 }
  0xe6   :  { %v121_v6 = vadd.f32 %v114_v5, %v51_v4 }
  0xe7   :  { %v187_v7 = vpop.f32.mrf.mxu0 }
  0xe8   :  { %124 = vst.msk [vmem:[#allocation2] sm:$0xff] %vm48_vm0, %v121_v6 }
  0xe9   :  { %v117_v9 = vpop.f32.mrf.mxu0 }
  0xea   :  { %v122_v10 = vadd.f32 %v117_v9, %v52_v8 }
  0xeb   :  { %v188_v11 = vpop.f32.mrf.mxu0 }
  0xec   :  { %125 = vst.msk [vmem:[#allocation2 + $0x8] sm:$0xff] %vm48_vm0, %v122_v10 }
  0xef   :  { %v129_v13 = vld [vmem:[#allocation2] sm:$0xff] }
  0xf0   :  { %v138_v14 = vadd.f32 %v173_v12, %v129_v13 }
  0xf2   :  { %v176_v15 = vpack.c.bf16 %v138_v14, %v138_v14 }
  0xf3   :  { %v130_v16 = vld [vmem:[#allocation2 + $0x8] sm:$0xff] }
  0xf4   :  { %v139_v17 = vadd.f32 %v173_v12, %v130_v16  ;;  %149 = vst.msk [vmem:[#allocation8] sm:$0xf] %vm148_vm3, %v176_v15 }
  0xf6   :  { %v177_v18 = vpack.c.bf16 %v139_v17, %v139_v17 }
  0xf8   :  { %150 = vst.msk [vmem:[#allocation8 + $0x4] sm:$0xf] %vm148_vm3, %v177_v18 }
  0xf9   :  { %250 = shalt.err (!%p247_p0)
}
  0xfa   :  { %162 = dma.vmem_to_hbm [thread:$0]  %s157_s25, 128, %s320_s3, [#allocation5], %s266_s15, %s266_s15, %s267_s16  }
  0xfb   :  { %263 = dma.done.wait [#allocation5], 128  }
  0xfc   :  { %264 = vsyncadd [#allocation5], 4294967168 }
  0xfd   :  { %166 = vsyncpa [#allocation4], 1 }
  0xfe   :  { %167 = vsyncpa [#allocation7], 1 }
  0xff   :  { %168 = vsyncpa [#allocation5], 1 }

</bundles_post_ra>
